<compile_context>
chip_gen: v5e
topology: v5e:2x2
jax: 0.10.0
libtpu: 0.0.40
codegen_flags: <defaults>
</compile_context>

<pallas_src>
import functools

import jax
import jax.numpy as jnp
from jax.experimental import pallas as pl
from jax.experimental.pallas import tpu as pltpu


# --------------------------------- kernel -------------------------------------

def patch_embed_kernel(p_ref, w_ref, b_ref, o_ref):
    # p_ref: (TM, K)   im2col patch rows (K possibly zero-padded to 128n)
    # w_ref: (K, D)    conv weight reshaped to a dense projection (same K pad)
    # b_ref: (1, D)    bias
    # o_ref: (TM, D)   embedded tokens
    acc = jnp.dot(p_ref[...], w_ref[...], preferred_element_type=jnp.float32)
    o_ref[...] = (acc + b_ref[...]).astype(o_ref.dtype)


# ------------------------------ wrapper / glue ---------------------------------

def _pick_row_tile(M, row_tile):
    """Row-tile policy: big tiles, but >= 2 tiles for medium M (v7x megacore)."""
    if M <= 128:
        return M                       # one block; block dim == full dim is legal
    if M <= 2 * row_tile:
        tm = max(128, ((-(-M // 2)) + 7) // 8 * 8)   # ceil(M/2) rounded up to 8
        return min(tm, row_tile)
    return row_tile


@functools.partial(
    jax.jit, static_argnames=("patch_size", "row_tile", "mxu_dtype", "out_dtype"))
def patch_embedding_forward(x, weight, bias, *, patch_size, row_tile=512,
                            mxu_dtype=jnp.bfloat16, out_dtype=jnp.float32):
    """Equivalent of PatchEmbedding.forward.

    x:      [B, C, H, W]   (NCHW, like PyTorch)
    weight: [D, C, p, p]   (PyTorch Conv2d weight, OIHW)
    bias:   [D]
    returns [B, Np, D], Np = (H//p)*(W//p), token order row-major over the
    patch grid (matches .flatten(2).transpose(1, 2)).
    """
    B, C, H, W = x.shape
    p = patch_size
    D = weight.shape[0]
    nph, npw = H // p, W // p
    Np = nph * npw
    CPP = C * p * p
    M = B * Np

    # Cast first (halves the bytes moved by the unfold transpose), then unfold
    # into non-overlapping patches flattened in (C, p, p) order so the
    # projection matrix is exactly weight.reshape(D, C*p*p).T.  Under jit the
    # cast + reshape/transpose (+ K pad below) fuse into one pass over x.
    if mxu_dtype is not None:
        x = x.astype(mxu_dtype)
        weight = weight.astype(mxu_dtype)
    patches = (
        x.reshape(B, C, nph, p, npw, p)
         .transpose(0, 2, 4, 1, 3, 5)
         .reshape(M, CPP)
    )
    w2d = weight.reshape(D, CPP).T                  # (CPP, D)
    b2d = bias.reshape(1, D).astype(jnp.float32)

    # Zero-pad K to a lane multiple (unmasked lane loads / full MXU K passes).
    K = pl.cdiv(CPP, 128) * 128
    if K != CPP:
        patches = jnp.pad(patches, ((0, 0), (0, K - CPP)))
        w2d = jnp.pad(w2d, ((0, K - CPP), (0, 0)))

    tm = _pick_row_tile(M, row_tile)
    grid_m = pl.cdiv(M, tm)

    # Only raise the scoped VMEM limit when the double-buffered footprint
    # would exceed the default (matters on v7x's smaller VMEM).
    est = (2 * tm * K * patches.dtype.itemsize
           + 2 * K * D * w2d.dtype.itemsize
           + 2 * D * 4
           + 2 * tm * D * jnp.dtype(out_dtype).itemsize)
    vmem_limit = int(min(1.5 * est, 100 * 1024 * 1024)) if est > (30 << 20) else None

    out = pl.pallas_call(
        patch_embed_kernel,
        out_shape=jax.ShapeDtypeStruct((M, D), out_dtype),
        grid=(grid_m,),
        in_specs=[
            pl.BlockSpec((tm, K), lambda i: (i, 0)),
            pl.BlockSpec((K, D), lambda i: (0, 0)),   # grid-invariant weight
            pl.BlockSpec((1, D), lambda i: (0, 0)),   # grid-invariant bias
        ],
        out_specs=pl.BlockSpec((tm, D), lambda i: (i, 0)),
        compiler_params=pltpu.CompilerParams(
            dimension_semantics=("parallel",),        # shards row tiles on v7x
            vmem_limit_bytes=vmem_limit),
    )(patches, w2d, b2d)

    return out.reshape(B, Np, D)


# ----------------------------------- main ---------------------------------------

if __name__ == "__main__":
    key = jax.random.PRNGKey(0)
    kx, kw, kb = jax.random.split(key, 3)

    def reference(x, weight, bias, p):
        # Exact Conv2d(kernel=stride=p) semantics, then flatten(2).transpose(1,2).
        B, C, H, W = x.shape
        D = weight.shape[0]
        Np = (H // p) * (W // p)
        r = jax.lax.conv_general_dilated(
            x, weight, window_strides=(p, p), padding="VALID",
            dimension_numbers=("NCHW", "OIHW", "NCHW"))
        r = r + bias[None, :, None, None]
        return r.reshape(B, D, Np).transpose(0, 2, 1)

    # Config implied by the PyTorch module.
    B, C, H, W, p, D = 2, 4, 16, 16, 4, 128
    x = jax.random.normal(kx, (B, C, H, W), jnp.float32)
    weight = jax.random.normal(kw, (D, C, p, p), jnp.float32) * (C * p * p) ** -0.5
    bias = jax.random.normal(kb, (D,), jnp.float32) * 0.02

    Np = (H // p) * (W // p)
    ref = reference(x, weight, bias, p)

    # 1) Default path: bf16 MXU operands, f32 accumulation / output.
    out = jax.block_until_ready(
        patch_embedding_forward(x, weight, bias, patch_size=p))
    assert out.shape == (B, Np, D), out.shape
    assert jnp.allclose(out, ref, atol=6e-2, rtol=5e-2), \
        float(jnp.max(jnp.abs(out - ref)))

    # 2) Exact f32 path (mxu_dtype=None): tight-tolerance Conv2d semantics check.
    out32 = jax.block_until_ready(
        patch_embedding_forward(x, weight, bias, patch_size=p, mxu_dtype=None))
    assert jnp.allclose(out32, ref, atol=1e-4, rtol=1e-4), \
        float(jnp.max(jnp.abs(out32 - ref)))

    # 3) Non-divisible row count (M = 144 > tm = 128): exercises the un-padded
    #    masked tail tile and the >= 2 row-tile split.
    B2 = 9
    x2 = jax.random.normal(kx, (B2, C, H, W), jnp.float32)
    out2 = jax.block_until_ready(
        patch_embedding_forward(x2, weight, bias, patch_size=p, mxu_dtype=None))
    ref2 = reference(x2, weight, bias, p)
    assert out2.shape == (B2, Np, D), out2.shape
    assert jnp.allclose(out2, ref2, atol=1e-4, rtol=1e-4), \
        float(jnp.max(jnp.abs(out2 - ref2)))

    print("KERNEL_OK")
</pallas_src>

<mosaic_0001>
module attributes {stable_mosaic.version = 11 : i64} {
  func.func @patch_embed_kernel(%arg0: i32, %arg1: memref<32x128xbf16, #tpu.memory_space<vmem>>, %arg2: memref<128x128xbf16, #tpu.memory_space<vmem>>, %arg3: memref<1x128xf32, #tpu.memory_space<vmem>>, %arg4: memref<32x128xf32, #tpu.memory_space<vmem>>) attributes {dimension_semantics = [#tpu.dimension_semantics<parallel>], iteration_bounds = array<i64: 1>, scalar_prefetch = 0 : i64, scratch_operands = 0 : i64, tpu.core_type = #tpu.core_type<tc>, window_params = [{transform_indices = @transform_0, window_bounds = array<i64: 32, 128>}, {pipeline_mode = #tpu.pipeline_mode<synchronous>, transform_indices = @transform_1, window_bounds = array<i64: 128, 128>}, {pipeline_mode = #tpu.pipeline_mode<synchronous>, transform_indices = @transform_2, window_bounds = array<i64: 1, 128>}, {transform_indices = @transform_3, window_bounds = array<i64: 32, 128>}]} {
    %c0 = arith.constant 0 : index
    %c0_0 = arith.constant 0 : index
    %0 = vector.load %arg1[%c0, %c0_0] : memref<32x128xbf16, #tpu.memory_space<vmem>>, vector<32x128xbf16>
    %c0_1 = arith.constant 0 : index
    %c0_2 = arith.constant 0 : index
    %1 = vector.load %arg2[%c0_1, %c0_2] : memref<128x128xbf16, #tpu.memory_space<vmem>>, vector<128x128xbf16>
    %cst = arith.constant dense<0.000000e+00> : vector<32x128xf32>
    %2 = tpu.matmul %0, %1, %cst {dimension_numbers = #tpu.dot_dimension_numbers<[1], [0], [0], [1], [0, 0, 1, 1], [], []>} : vector<32x128xbf16>, vector<128x128xbf16>, vector<32x128xf32> -> vector<32x128xf32>
    %c0_3 = arith.constant 0 : index
    %c0_4 = arith.constant 0 : index
    %3 = vector.load %arg3[%c0_3, %c0_4] : memref<1x128xf32, #tpu.memory_space<vmem>>, vector<1x128xf32>
    %4 = vector.broadcast %3 : vector<1x128xf32> to vector<32x128xf32>
    %5 = arith.addf %2, %4 : vector<32x128xf32>
    %c0_5 = arith.constant 0 : index
    %c0_6 = arith.constant 0 : index
    %6 = vector.load %arg4[%c0_5, %c0_6] : memref<32x128xf32, #tpu.memory_space<vmem>>, vector<32x128xf32>
    tpu.vector_store %arg4[%c0_5, %c0_6], %5 {strides = array<i32>} : memref<32x128xf32, #tpu.memory_space<vmem>>, vector<32x128xf32>,
    return
  }
  func.func @transform_0(%arg0: i32) -> (i32, i32) {
    %c0_i32 = arith.constant 0 : i32
    %c0_i32_0 = arith.constant 0 : i32
    return %arg0, %c0_i32 : i32, i32
  }
  func.func @transform_1(%arg0: i32) -> (i32, i32) {
    %c0_i32 = arith.constant 0 : i32
    %c0_i32_0 = arith.constant 0 : i32
    %c0_i32_1 = arith.constant 0 : i32
    return %c0_i32, %c0_i32_0 : i32, i32
  }
  func.func @transform_2(%arg0: i32) -> (i32, i32) {
    %c0_i32 = arith.constant 0 : i32
    %c0_i32_0 = arith.constant 0 : i32
    %c0_i32_1 = arith.constant 0 : i32
    return %c0_i32, %c0_i32_0 : i32, i32
  }
  func.func @transform_3(%arg0: i32) -> (i32, i32) {
    %c0_i32 = arith.constant 0 : i32
    %c0_i32_0 = arith.constant 0 : i32
    return %arg0, %c0_i32 : i32, i32
  }
}

</mosaic_0001>

<bundles_post_ra>
// kernel: patch_embedding_forward.1
= control target key start
LH: loop header
LB: loop body
LE: loop exit
PB: predicated region body
PF: predicated region fallthrough
CT: control target
= control target key end

     0   :  { %s287_s0 = inlined_call_operand.vmem [shape: bf16[32,128], index: 0, kind: input, shape index: {}]   ;;  %s288_s1 = inlined_call_operand.vmem [shape: bf16[128,128], index: 1, kind: input, shape index: {}]   ;;  %s289_s2 = inlined_call_operand.vmem [shape: f32[1,128], index: 2, kind: input, shape index: {}]   ;;  %s290_s3 = inlined_call_operand.hbm [shape: f32[32,128], index: 3, kind: output, shape index: {}]  }
   0x1   :  { %v189_v0 = vld [vmem:[%s288_s1 + $0x38] sm:$0xff]  ;;  %v188_v1 = vld [vmem:[%s288_s1 + $0x30] sm:$0xff] }
   0x2   :  { %99 = vmatpush.bf16.msra.mxu0 %v189_v0  ;;  %190 = vmatpush.bf16.msra.mxu1 %v189_v0 }
   0x3   :  { %8 = vsyncpa [#allocation3], 0  ;;  %v187_v2 = vld [vmem:[%s288_s1 + $0x28] sm:$0xff]  ;;  %v186_v3 = vld [vmem:[%s288_s1 + $0x20] sm:$0xff]  ;;  %s230_s10 = smov 8  }
   0x4   :  { %v185_v4 = vld [vmem:[%s288_s1 + $0x18] sm:$0xff]  ;;  %v184_v5 = vld [vmem:[%s288_s1 + $0x10] sm:$0xff]  ;;  %v183_v6 = vld [vmem:[%s288_s1 + $0x8] sm:$0xff] }
   0x5   :  { %v182_v7 = vld [vmem:[%s288_s1] sm:$0xff]  ;;  %v181_v9 = vld [vmem:[%s287_s0 + $0x8] sm:$0xff]  ;;  %s228_s1 = smov [#allocation2]  }
   0x6   :  { %100 = vmatpush.bf16.msra.mxu0 %v188_v1  ;;  %191 = vmatpush.bf16.msra.mxu1 %v188_v1  ;;  %v180_v8 = vld [vmem:[%s287_s0] sm:$0xff]  ;;  %s126_s7 = sshll.u32 %s228_s1, 4  ;;  %s128_s0 = sshll.u32 %s290_s3, 4  ;;  %s127_s7 = int_to_ptr.vmem [resolvable:$true] %s126_s7  ;;  %s129_s0 = int_to_ptr.hbm [resolvable:$true] %s128_s0 }
   0x7   :  { %v201_v10 = vld [vmem:[%s289_s2] ss:$0 sm:$0xff]  ;;  %s229_s2 = smov 128  }
   0xa   :  { %101 = vmatpush.bf16.msra.mxu0 %v187_v2  ;;  %192 = vmatpush.bf16.msra.mxu1 %v187_v2 }
   0xe   :  { %102 = vmatpush.bf16.msra.mxu0 %v186_v3  ;;  %193 = vmatpush.bf16.msra.mxu1 %v186_v3 }
  0x12   :  { %103 = vmatpush.bf16.msra.mxu0 %v185_v4  ;;  %194 = vmatpush.bf16.msra.mxu1 %v185_v4 }
  0x16   :  { %104 = vmatpush.bf16.msra.mxu0 %v184_v5  ;;  %195 = vmatpush.bf16.msra.mxu1 %v184_v5 }
  0x1a   :  { %105 = vmatpush.bf16.msra.mxu0 %v183_v6  ;;  %196 = vmatpush.bf16.msra.mxu1 %v183_v6 }
  0x1e   :  { %106 = vmatpush.bf16.msra.mxu0 %v182_v7  ;;  %197 = vmatpush.bf16.msra.mxu1 %v182_v7 }
  0x21   :  { %107 = vmatmul.bf16.vlgmr.msra.gmra.mxu0 %v180_v8  ;;  %112 = vmatmul.bf16.vlgmr.msra.gmra.mxu1 %v181_v9 }
  0x9e   :  { %v108_v11 = vpop.f32.mrf.mxu0  ;;  %v113_v12 = vpop.f32.mrf.mxu1 }
  0x9f   :  { %v109_v13 = vadd.f32 %v201_v10, %v108_v11  ;;  %v114_v14 = vadd.f32 %v201_v10, %v113_v12 }
  0xa1   :  { %118 = vst [vmem:[#allocation2] sm:$0xff] %v109_v13 }
  0xa2   :  { %120 = vst [vmem:[#allocation2 + $0x10] sm:$0xff] %v114_v14 }
  0xa6   :  { %v110_v15 = vpop.f32.mrf.mxu0  ;;  %v115_v16 = vpop.f32.mrf.mxu1 }
  0xa7   :  { %v111_v17 = vadd.f32 %v201_v10, %v110_v15  ;;  %v116_v18 = vadd.f32 %v201_v10, %v115_v16 }
  0xa9   :  { %119 = vst [vmem:[#allocation2 + $0x8] sm:$0xff] %v111_v17 }
  0xaa   :  { %121 = vst [vmem:[#allocation2 + $0x18] sm:$0xff] %v116_v18 }
  0xab   :  { %134 = dma.vmem_to_hbm [thread:$0]  %s127_s7, 512, %s129_s0, [#allocation3], %s229_s2, %s229_s2, %s230_s10  }
  0xac   :  { %226 = dma.done.wait [#allocation3], 512  }
  0xad   :  { %227 = vsyncadd [#allocation3], 4294966784 }
  0xae   :  { %139 = vsyncpa [#allocation3], 1 }

</bundles_post_ra>
